<compile_context>
chip_gen: v7x
topology: tpu7x:2x2x1
jax: 0.10.0
libtpu: 0.0.40
codegen_flags: <defaults>
</compile_context>

<pallas_src>
import jax
import jax.numpy as jnp
from jax.experimental import pallas as pl
from jax.experimental.pallas import tpu as pltpu


def _round_up(n, m):
    return ((n + m - 1) // m) * m


# ----------------------------------------------------------------------------
# Kernels
# ----------------------------------------------------------------------------
def _fused_kernel(x_ref, w_ref, b_ref, o_ref):
    # y = sum_k x[:, k] * w[0, k] + b  — pure VPU multiply + XLU lane reduce;
    # the degenerate N=1 matmul never touches the MXU.
    o_ref[...] = (jnp.sum(x_ref[...] * w_ref[...], axis=-1, keepdims=True)
                  + b_ref[...])


def _mlp3_kernel(x_ref, w1_ref, b1_ref, w2_ref, b2_ref, w3r_ref, b3_ref, o_ref):
    # Layer 1: (TB, in_dim) @ (in_dim, 1024) — bf16 operands on the MXU,
    # f32 accumulation, f32 bias add on the VPU.
    h1 = jnp.dot(x_ref[...].astype(jnp.bfloat16), w1_ref[...],
                 preferred_element_type=jnp.float32) + b1_ref[...]
    # Layer 2: (TB, 1024) @ (1024, 256) — 218 padded to 256 lanes.
    h2 = jnp.dot(h1.astype(jnp.bfloat16), w2_ref[...],
                 preferred_element_type=jnp.float32) + b2_ref[...]
    # Layer 3: N=1 matmul replaced by an f32 VPU multiply + XLU reduce
    # (padded lanes of h2 and w3 are zero, so they contribute nothing).
    o_ref[...] = (jnp.sum(h2 * w3r_ref[...], axis=-1, keepdims=True)
                  + b3_ref[...])


# ----------------------------------------------------------------------------
# Wrappers
# ----------------------------------------------------------------------------
def fuse_affine(w1, b1, w2, b2, w3, b3):
    """Fold the activation-free 3-layer MLP into one affine map (f32).

    Must be recomputed if the underlying layer weights change.
    """
    w_f = w1 @ w2 @ w3                      # (in_dim, 1)
    b_f = b1 @ w2 @ w3 + b2 @ w3 + b3       # (1, 1)
    return w_f, b_f


def _batch_tiling(B):
    """Pad batch to full sublanes and pick a batch tile / grid."""
    b_pad = _round_up(max(B, 8), 8)
    tb = min(256, b_pad)
    b_pad = _round_up(b_pad, tb)
    return b_pad, tb, b_pad // tb


@jax.jit
def predict_concentration_fused(x, w_f, b_f):
    """x: (B, hidden*max_len) f32, w_f: (in_dim, 1), b_f: (1, 1) -> (B, 1)."""
    B, in_dim = x.shape
    b_pad, tb, n_tiles = _batch_tiling(B)
    x_p = jnp.zeros((b_pad, in_dim), jnp.float32).at[:B, :].set(x)
    w_row = w_f.reshape(1, in_dim)           # lane-major row for the VPU reduce

    cost = pl.CostEstimate(
        flops=2 * b_pad * in_dim,
        transcendentals=0,
        bytes_accessed=(x_p.size + w_row.size + b_f.size + b_pad) * 4,
    )
    out = pl.pallas_call(
        _fused_kernel,
        out_shape=jax.ShapeDtypeStruct((b_pad, 1), jnp.float32),
        grid=(n_tiles,),
        in_specs=[
            pl.BlockSpec((tb, in_dim), lambda i: (i, 0)),
            pl.BlockSpec((1, in_dim), lambda i: (0, 0)),
            pl.BlockSpec((1, 1), lambda i: (0, 0)),
        ],
        out_specs=pl.BlockSpec((tb, 1), lambda i: (i, 0)),
        compiler_params=pltpu.CompilerParams(
            dimension_semantics=("parallel",)),
        cost_estimate=cost,
    )(x_p, w_row, b_f)
    return out[:B]


@jax.jit
def predict_concentration(x, w1, b1, w2, b2, w3, b3):
    """Faithful 3-layer forward.  Weights stored (in, out): y = x @ W + b."""
    B, in_dim = x.shape
    h1_dim = w1.shape[1]                     # 1024
    h2_dim = w2.shape[1]                     # 218
    h2_pad = _round_up(h2_dim, 128)          # 256: unmasked vregs, aligned DMA
    b_pad, tb, n_tiles = _batch_tiling(B)

    # Layout / precision prep (outside the kernel; constant-folds under jit
    # when the weights are compile-time constants).
    x_p = jnp.zeros((b_pad, in_dim), jnp.float32).at[:B, :].set(x)
    w1_bf = w1.astype(jnp.bfloat16)
    w2_bf = jnp.zeros((h1_dim, h2_pad), jnp.bfloat16).at[:, :h2_dim].set(
        w2.astype(jnp.bfloat16))
    b2_p = jnp.zeros((1, h2_pad), jnp.float32).at[:, :h2_dim].set(b2)
    w3_row = jnp.zeros((1, h2_pad), jnp.float32).at[:, :h2_dim].set(w3.T)

    flops = 2 * b_pad * (in_dim * h1_dim + h1_dim * h2_pad + h2_pad)
    bytes_accessed = (x_p.size * 4 + w1_bf.size * 2 + b1.size * 4
                      + w2_bf.size * 2 + b2_p.size * 4
                      + w3_row.size * 4 + b3.size * 4 + b_pad * 4)
    cost = pl.CostEstimate(flops=flops, transcendentals=0,
                           bytes_accessed=bytes_accessed)

    out = pl.pallas_call(
        _mlp3_kernel,
        out_shape=jax.ShapeDtypeStruct((b_pad, 1), jnp.float32),
        grid=(n_tiles,),
        in_specs=[
            pl.BlockSpec((tb, in_dim), lambda i: (i, 0)),      # x tile
            pl.BlockSpec((in_dim, h1_dim), lambda i: (0, 0)),  # W1 (constant)
            pl.BlockSpec((1, h1_dim), lambda i: (0, 0)),       # b1
            pl.BlockSpec((h1_dim, h2_pad), lambda i: (0, 0)),  # W2 (constant)
            pl.BlockSpec((1, h2_pad), lambda i: (0, 0)),       # b2
            pl.BlockSpec((1, h2_pad), lambda i: (0, 0)),       # W3 row
            pl.BlockSpec((1, 1), lambda i: (0, 0)),            # b3
        ],
        out_specs=pl.BlockSpec((tb, 1), lambda i: (i, 0)),
        compiler_params=pltpu.CompilerParams(
            dimension_semantics=("parallel",)),
        cost_estimate=cost,
    )(x_p, w1_bf, b1, w2_bf, b2_p, w3_row, b3)
    return out[:B]


# ----------------------------------------------------------------------------
# Parameters / test harness
# ----------------------------------------------------------------------------
def init_params(key, hidden, max_len):
    """Deterministic synthetic parameters (shapes from the module __init__)."""
    in_dim = hidden * max_len
    k1, k2, k3, k4, k5, k6 = jax.random.split(key, 6)
    # Stored (in, out) so the kernel does x @ W + b (== torch x @ W_t.T + b).
    w1 = jax.random.normal(k1, (in_dim, 1024), jnp.float32) * 0.02
    b1 = jax.random.normal(k2, (1, 1024), jnp.float32) * 0.02
    w2 = jax.random.normal(k3, (1024, 218), jnp.float32) * 0.02
    b2 = jax.random.normal(k4, (1, 218), jnp.float32) * 0.02
    w3 = jax.random.normal(k5, (218, 1), jnp.float32) * 0.02
    b3 = jax.random.normal(k6, (1, 1), jnp.float32) * 0.02
    return w1, b1, w2, b2, w3, b3


if __name__ == "__main__":
    hidden, max_len, batch = 32, 8, 2
    key = jax.random.PRNGKey(0)
    kx, kp = jax.random.split(key)

    x = jax.random.normal(kx, (batch, hidden * max_len), jnp.float32)
    params = init_params(kp, hidden, max_len)
    w1, b1, w2, b2, w3, b3 = params

    # Pure-JAX f32 reference (same math as the torch module).
    ref = ((x @ w1 + b1) @ w2 + b2) @ w3 + b3

    # Primary path: offline affine fusion + single matvec kernel (f32).
    w_f, b_f = fuse_affine(*params)
    out_fused = jax.block_until_ready(predict_concentration_fused(x, w_f, b_f))
    assert out_fused.shape == (batch, 1)
    assert jnp.allclose(out_fused, ref, atol=1e-4, rtol=1e-4), (
        float(jnp.max(jnp.abs(out_fused - ref))))

    # Faithful 3-layer kernel (bf16 matmul operands, f32 accumulation).
    out_mlp = jax.block_until_ready(predict_concentration(x, *params))
    assert out_mlp.shape == (batch, 1)
    assert jnp.allclose(out_mlp, ref, atol=1e-2, rtol=1e-2), (
        float(jnp.max(jnp.abs(out_mlp - ref))))

    print("KERNEL_OK")
</pallas_src>

<mosaic_0001>
module attributes {stable_mosaic.version = 11 : i64} {
  func.func @_fused_kernel(%arg0: i32, %arg1: memref<8x256xf32, #tpu.memory_space<vmem>>, %arg2: memref<1x256xf32, #tpu.memory_space<vmem>>, %arg3: memref<1x1xf32, #tpu.memory_space<vmem>>, %arg4: memref<8x1xf32, #tpu.memory_space<vmem>>) attributes {dimension_semantics = [#tpu.dimension_semantics<parallel>], iteration_bounds = array<i64: 1>, scalar_prefetch = 0 : i64, scratch_operands = 0 : i64, tpu.core_type = #tpu.core_type<tc>, window_params = [{transform_indices = @transform_0, window_bounds = array<i64: 8, 256>}, {pipeline_mode = #tpu.pipeline_mode<synchronous>, transform_indices = @transform_1, window_bounds = array<i64: 1, 256>}, {pipeline_mode = #tpu.pipeline_mode<synchronous>, transform_indices = @transform_2, window_bounds = array<i64: 1, 1>}, {transform_indices = @transform_3, window_bounds = array<i64: 8, 1>}]} {
    %c0 = arith.constant 0 : index
    %c0_0 = arith.constant 0 : index
    %0 = vector.load %arg1[%c0, %c0_0] : memref<8x256xf32, #tpu.memory_space<vmem>>, vector<8x256xf32>
    %c0_1 = arith.constant 0 : index
    %c0_2 = arith.constant 0 : index
    %1 = vector.load %arg2[%c0_1, %c0_2] : memref<1x256xf32, #tpu.memory_space<vmem>>, vector<1x256xf32>
    %2 = vector.broadcast %1 : vector<1x256xf32> to vector<8x256xf32>
    %3 = arith.mulf %0, %2 : vector<8x256xf32>
    %cst = arith.constant dense<0.000000e+00> : vector<8xf32>
    %4 = vector.multi_reduction <add>, %3, %cst [1] : vector<8x256xf32> to vector<8xf32>
    %5 = vector.shape_cast %4 : vector<8xf32> to vector<8x1xf32>
    %c0_3 = arith.constant 0 : index
    %c0_4 = arith.constant 0 : index
    %6 = vector.load %arg3[%c0_3, %c0_4] : memref<1x1xf32, #tpu.memory_space<vmem>>, vector<1x1xf32>
    %7 = vector.broadcast %6 : vector<1x1xf32> to vector<8x1xf32>
    %8 = arith.addf %5, %7 : vector<8x1xf32>
    %c0_5 = arith.constant 0 : index
    %c0_6 = arith.constant 0 : index
    %9 = vector.load %arg4[%c0_5, %c0_6] : memref<8x1xf32, #tpu.memory_space<vmem>>, vector<8x1xf32>
    tpu.vector_store %arg4[%c0_5, %c0_6], %8 {strides = array<i32>} : memref<8x1xf32, #tpu.memory_space<vmem>>, vector<8x1xf32>,
    return
  }
  func.func @transform_0(%arg0: i32) -> (i32, i32) {
    %c0_i32 = arith.constant 0 : i32
    %c0_i32_0 = arith.constant 0 : i32
    return %arg0, %c0_i32 : i32, i32
  }
  func.func @transform_1(%arg0: i32) -> (i32, i32) {
    %c0_i32 = arith.constant 0 : i32
    %c0_i32_0 = arith.constant 0 : i32
    %c0_i32_1 = arith.constant 0 : i32
    return %c0_i32, %c0_i32_0 : i32, i32
  }
  func.func @transform_2(%arg0: i32) -> (i32, i32) {
    %c0_i32 = arith.constant 0 : i32
    %c0_i32_0 = arith.constant 0 : i32
    %c0_i32_1 = arith.constant 0 : i32
    return %c0_i32, %c0_i32_0 : i32, i32
  }
  func.func @transform_3(%arg0: i32) -> (i32, i32) {
    %c0_i32 = arith.constant 0 : i32
    %c0_i32_0 = arith.constant 0 : i32
    return %arg0, %c0_i32 : i32, i32
  }
}

</mosaic_0001>

<bundles_post_ra>
// kernel: predict_concentration_fused.1
= control target key start
LH: loop header
LB: loop body
LE: loop exit
PB: predicated region body
PF: predicated region fallthrough
CT: control target
= control target key end

     0   :  { %v20_v0 = vlaneseq  ;;  %vm43_vm0 = vcmask 7168   ;;  %s85_s1 = inlined_call_operand.vmem [shape: f32[1,256], index: 1, kind: input, shape index: {}]   ;;  %s86_s2 = inlined_call_operand.<no memory space> [shape: f32[1,1], index: 2, kind: input, shape index: {}]   ;;  %s87_s0 = inlined_call_operand.vmem [shape: f32[8,256], index: 0, kind: input, shape index: {}]   ;;  %s88_s3 = inlined_call_operand.vmem [shape: f32[8,1], index: 3, kind: output, shape index: {}]  }
   0x1   :  { %v8_v1 = vstv %s86_s2  ;;  %v18_v3 = vld [vmem:[%s85_s1] sm:$0x3]  ;;  %v17_v7 = vld [vmem:[%s87_s0 + $0x8] sm:$0xff] }
   0x2   :  { %v21_v2 = vshrl.u32 %v20_v0, 7  ;;  %9 = vst [vmem:[#allocation2] sm:$0x1] %v8_v1  ;;  %v16_v6 = vld [vmem:[%s87_s0] sm:$0xff] }
   0x4   :  { %v22_v4 = vsub.s32 0, %v21_v2  ;;  %v26_v5 = vsub.s32 1, %v21_v2 }
   0x6   :  { %v23_v8 = vrot.slane %v18_v3, %v22_v4  ;;  %v27_v9 = vrot.slane %v18_v3, %v26_v5 }
   0x8   :  { %v30_v10 = vmul.f32 %v23_v8, %v16_v6  ;;  %v31_v11 = vmul.f32 %v27_v9, %v17_v7 }
   0x9   :  { %v49_v13 = vld [vmem:[#allocation2] ss:$0 sm:$0xff] }
   0xa   :  { %v32_v12 = vadd.f32 %v31_v11, %v30_v10 }
   0xc   :  { %33 = vadd.xlane.f32.xlu0 %v32_v12 }
  0x99   :  { %v34_v14 = vpop.xlane.xlu0 %33 }
  0x9a   :  { %v42_v15 = vadd.f32 %v49_v13, %v34_v14 }
  0x9c   :  { %44 = vst.msk [vmem:[%s88_s3] sm:$0xff] %vm43_vm0, %v42_v15 }

</bundles_post_ra>
